<compile_context>
chip_gen: v6e
topology: v6e:2x2x1
jax: 0.10.0
libtpu: 0.0.40
codegen_flags: <defaults>
</compile_context>

<pallas_src>
import jax
import jax.numpy as jnp
from jax.experimental import pallas as pl
from jax.experimental.pallas import tpu as pltpu


def _round_up(x, m):
    return ((x + m - 1) // m) * m


def _mlp_kernel(x_ref, w1_ref, b1_ref, w2_ref, b2_ref, o_ref, h_ref):
    # Grid = (batch tiles, output-column tiles of the 2nd matmul). The column
    # axis is last ("arbitrary"), so for each batch tile the first layer is
    # computed once (j == 0) and cached in VMEM scratch for all column tiles.
    @pl.when(pl.program_id(1) == 0)
    def _():
        h = jnp.dot(x_ref[...], w1_ref[...], preferred_element_type=jnp.float32)
        h = h + b1_ref[...].astype(jnp.float32)
        h_ref[...] = jnp.maximum(h, 0.0)          # ReLU in f32 on the VPU

    o = jnp.dot(h_ref[...].astype(w2_ref.dtype), w2_ref[...],
                preferred_element_type=jnp.float32)
    o = o + b2_ref[...].astype(jnp.float32)
    o_ref[...] = o.astype(o_ref.dtype)


def _build_call(B_pad, C_pad, E_pad, tile_b, tile_e, x_dtype, w_dtype):
    grid_b = B_pad // tile_b
    grid_e = E_pad // tile_e

    in_specs = [
        pl.BlockSpec((tile_b, C_pad), lambda i, j: (i, 0)),   # x batch tile
        pl.BlockSpec((C_pad, E_pad), lambda i, j: (0, 0)),    # w1 (whole, grid-invariant)
        pl.BlockSpec((1, E_pad), lambda i, j: (0, 0)),        # b1
        pl.BlockSpec((E_pad, tile_e), lambda i, j: (0, j)),   # w2 column slab
        pl.BlockSpec((1, tile_e), lambda i, j: (0, j)),       # b2 column slab
    ]
    out_specs = pl.BlockSpec((tile_b, tile_e), lambda i, j: (i, j))

    itm = jnp.dtype(x_dtype).itemsize
    wtm = jnp.dtype(w_dtype).itemsize
    # Conservative (everything double-buffered) VMEM estimate + headroom,
    # capped so it stays inside v7x's 64 MiB physical VMEM.
    vmem_bytes = (2 * tile_b * C_pad * itm + 2 * tile_b * tile_e * itm
                  + 2 * C_pad * E_pad * wtm + 2 * E_pad * tile_e * wtm
                  + 2 * (E_pad + tile_e) * wtm
                  + tile_b * E_pad * 4)
    vmem_limit = int(min(max(vmem_bytes + (4 << 20), 32 << 20), 64 << 20))

    flops = 2 * B_pad * C_pad * E_pad + 2 * B_pad * E_pad * E_pad
    bytes_accessed = (B_pad * C_pad * itm + B_pad * E_pad * itm
                      + C_pad * E_pad * wtm + E_pad * E_pad * wtm
                      + 2 * E_pad * wtm)

    return pl.pallas_call(
        _mlp_kernel,
        out_shape=jax.ShapeDtypeStruct((B_pad, E_pad), x_dtype),
        grid_spec=pltpu.PrefetchScalarGridSpec(
            num_scalar_prefetch=0,
            grid=(grid_b, grid_e),
            in_specs=in_specs,
            out_specs=out_specs,
            scratch_shapes=[pltpu.VMEM((tile_b, E_pad), jnp.float32)],  # cached ReLU(h)
        ),
        compiler_params=pltpu.CompilerParams(
            dimension_semantics=("parallel", "arbitrary"),
            vmem_limit_bytes=vmem_limit,
        ),
        cost_estimate=pl.CostEstimate(flops=flops, transcendentals=0,
                                      bytes_accessed=bytes_accessed),
    )


def context_embedding(x, w1, b1, w2, b2, *, tile_b=None, tile_e=None):
    """Fused  relu(x @ w1 + b1) @ w2 + b2  on TPU.

    x  : (B, C)   w1 : (C, E)  (transposed Linear weight)   b1 : (E,)
                  w2 : (E, E)  (transposed Linear weight)   b2 : (E,)
    Arbitrary B / C / E are handled by zero-padding and slicing the result.
    """
    B, C = x.shape
    Cw, E = w1.shape
    assert Cw == C and w2.shape == (E, E) and b1.shape == (E,) and b2.shape == (E,)

    sub = 16 if x.dtype == jnp.bfloat16 else 8   # sublane multiple per dtype

    # Lane-align feature dims (dense stores, full-width MXU tiles).
    C_pad = _round_up(C, 128)
    E_pad = _round_up(E, 128)

    # Bounded, sublane-aligned batch tile (grid > 1 => pipelining + megacore).
    if tile_b is None:
        tile_b = min(_round_up(B, sub), 512)
    tile_b = max(sub, _round_up(int(tile_b), sub))
    B_pad = _round_up(B, tile_b)

    # Output-column tile for the 2nd matmul; bounds the resident w2 slab in VMEM.
    if tile_e is None:
        tile_e = min(E_pad, 2048)
    tile_e = max(128, min(_round_up(int(tile_e), 128), E_pad))
    E_pad = _round_up(E_pad, tile_e)   # make the column grid divide evenly

    # Zero-padding keeps the math exact on the un-padded region.
    xp = jnp.zeros((B_pad, C_pad), x.dtype).at[:B, :C].set(x)
    w1p = jnp.zeros((C_pad, E_pad), w1.dtype).at[:C, :E].set(w1)
    b1p = jnp.zeros((1, E_pad), b1.dtype).at[0, :E].set(b1)
    w2p = jnp.zeros((E_pad, E_pad), w2.dtype).at[:E, :E].set(w2)
    b2p = jnp.zeros((1, E_pad), b2.dtype).at[0, :E].set(b2)

    call = _build_call(B_pad, C_pad, E_pad, tile_b, tile_e, x.dtype, w1.dtype)
    out = call(xp, w1p, b1p, w2p, b2p)
    return out[:B, :E]


def _reference(x, w1, b1, w2, b2):
    h = jnp.maximum(x @ w1 + b1, 0.0)
    return h @ w2 + b2


if __name__ == "__main__":
    key = jax.random.PRNGKey(0)

    # Case 1: shapes like the module (context_dim=16, embedding_dim=32); batch
    # not a multiple of the tile -> exercises padding + multiple batch tiles.
    B, C, E = 20, 16, 32
    kx, kw1, kb1, kw2, kb2, key = jax.random.split(key, 6)
    x = jax.random.normal(kx, (B, C), dtype=jnp.float32)
    w1 = jax.random.normal(kw1, (C, E), dtype=jnp.float32) * 0.1
    b1 = jax.random.normal(kb1, (E,), dtype=jnp.float32) * 0.1
    w2 = jax.random.normal(kw2, (E, E), dtype=jnp.float32) * 0.1
    b2 = jax.random.normal(kb2, (E,), dtype=jnp.float32) * 0.1

    out = jax.block_until_ready(context_embedding(x, w1, b1, w2, b2, tile_b=8))
    ref = _reference(x, w1, b1, w2, b2)
    assert out.shape == (B, E)
    assert jnp.allclose(out, ref, atol=1e-4, rtol=1e-4), "case 1 mismatch vs reference"

    # Case 2: larger embedding with explicit column tiling of w2 (exercises the
    # cached first-layer activation reused across output-column grid steps).
    B2, C2, E2 = 12, 40, 256
    kx, kw1, kb1, kw2, kb2, key = jax.random.split(key, 6)
    x2 = jax.random.normal(kx, (B2, C2), dtype=jnp.float32)
    w1_2 = jax.random.normal(kw1, (C2, E2), dtype=jnp.float32) * 0.05
    b1_2 = jax.random.normal(kb1, (E2,), dtype=jnp.float32) * 0.05
    w2_2 = jax.random.normal(kw2, (E2, E2), dtype=jnp.float32) * 0.05
    b2_2 = jax.random.normal(kb2, (E2,), dtype=jnp.float32) * 0.05

    out2 = jax.block_until_ready(
        context_embedding(x2, w1_2, b1_2, w2_2, b2_2, tile_e=128))
    ref2 = _reference(x2, w1_2, b1_2, w2_2, b2_2)
    assert out2.shape == (B2, E2)
    assert jnp.allclose(out2, ref2, atol=1e-4, rtol=1e-4), "case 2 mismatch vs reference"

    print("KERNEL_OK")
</pallas_src>

<mosaic_0001>
module attributes {stable_mosaic.version = 11 : i64} {
  func.func @_mlp_kernel(%arg0: i32, %arg1: i32, %arg2: memref<8x128xf32, #tpu.memory_space<vmem>>, %arg3: memref<128x128xf32, #tpu.memory_space<vmem>>, %arg4: memref<1x128xf32, #tpu.memory_space<vmem>>, %arg5: memref<128x128xf32, #tpu.memory_space<vmem>>, %arg6: memref<1x128xf32, #tpu.memory_space<vmem>>, %arg7: memref<8x128xf32, #tpu.memory_space<vmem>>, %arg8: memref<8x128xf32, #tpu.memory_space<vmem>>) attributes {dimension_semantics = [#tpu.dimension_semantics<parallel>, #tpu.dimension_semantics<arbitrary>], iteration_bounds = array<i64: 3, 1>, scalar_prefetch = 0 : i64, scratch_operands = 1 : i64, tpu.core_type = #tpu.core_type<tc>, window_params = [{transform_indices = @transform_0, window_bounds = array<i64: 8, 128>}, {pipeline_mode = #tpu.pipeline_mode<synchronous>, transform_indices = @transform_1, window_bounds = array<i64: 128, 128>}, {pipeline_mode = #tpu.pipeline_mode<synchronous>, transform_indices = @transform_2, window_bounds = array<i64: 1, 128>}, {transform_indices = @transform_3, window_bounds = array<i64: 128, 128>}, {transform_indices = @transform_4, window_bounds = array<i64: 1, 128>}, {transform_indices = @transform_5, window_bounds = array<i64: 8, 128>}]} {
    %c0_i32 = arith.constant 0 : i32
    %0 = arith.cmpi eq, %arg1, %c0_i32 : i32
    %1 = arith.extui %0 : i1 to i32
    %c0_i32_0 = arith.constant 0 : i32
    %2 = arith.cmpi ne, %1, %c0_i32_0 : i32
    scf.if %2 {
      %c0_8 = arith.constant 0 : index
      %c0_9 = arith.constant 0 : index
      %10 = vector.load %arg2[%c0_8, %c0_9] : memref<8x128xf32, #tpu.memory_space<vmem>>, vector<8x128xf32>
      %c0_10 = arith.constant 0 : index
      %c0_11 = arith.constant 0 : index
      %11 = vector.load %arg3[%c0_10, %c0_11] : memref<128x128xf32, #tpu.memory_space<vmem>>, vector<128x128xf32>
      %cst_12 = arith.constant dense<0.000000e+00> : vector<8x128xf32>
      %12 = tpu.matmul %10, %11, %cst_12 {dimension_numbers = #tpu.dot_dimension_numbers<[1], [0], [0], [1], [0, 0, 1, 1], [], []>} : vector<8x128xf32>, vector<128x128xf32>, vector<8x128xf32> -> vector<8x128xf32>
      %c0_13 = arith.constant 0 : index
      %c0_14 = arith.constant 0 : index
      %13 = vector.load %arg4[%c0_13, %c0_14] : memref<1x128xf32, #tpu.memory_space<vmem>>, vector<1x128xf32>
      %14 = vector.broadcast %13 : vector<1x128xf32> to vector<8x128xf32>
      %15 = arith.addf %12, %14 : vector<8x128xf32>
      %cst_15 = arith.constant 0.000000e+00 : f32
      %16 = vector.broadcast %cst_15 : f32 to vector<8x128xf32>
      %17 = arith.maximumf %15, %16 : vector<8x128xf32>
      %c0_16 = arith.constant 0 : index
      %c0_17 = arith.constant 0 : index
      %18 = vector.load %arg8[%c0_16, %c0_17] : memref<8x128xf32, #tpu.memory_space<vmem>>, vector<8x128xf32>
      tpu.vector_store %arg8[%c0_16, %c0_17], %17 {strides = array<i32>} : memref<8x128xf32, #tpu.memory_space<vmem>>, vector<8x128xf32>,
    } else {
    }
    %c0 = arith.constant 0 : index
    %c0_1 = arith.constant 0 : index
    %3 = vector.load %arg8[%c0, %c0_1] : memref<8x128xf32, #tpu.memory_space<vmem>>, vector<8x128xf32>
    %c0_2 = arith.constant 0 : index
    %c0_3 = arith.constant 0 : index
    %4 = vector.load %arg5[%c0_2, %c0_3] : memref<128x128xf32, #tpu.memory_space<vmem>>, vector<128x128xf32>
    %cst = arith.constant dense<0.000000e+00> : vector<8x128xf32>
    %5 = tpu.matmul %3, %4, %cst {dimension_numbers = #tpu.dot_dimension_numbers<[1], [0], [0], [1], [0, 0, 1, 1], [], []>} : vector<8x128xf32>, vector<128x128xf32>, vector<8x128xf32> -> vector<8x128xf32>
    %c0_4 = arith.constant 0 : index
    %c0_5 = arith.constant 0 : index
    %6 = vector.load %arg6[%c0_4, %c0_5] : memref<1x128xf32, #tpu.memory_space<vmem>>, vector<1x128xf32>
    %7 = vector.broadcast %6 : vector<1x128xf32> to vector<8x128xf32>
    %8 = arith.addf %5, %7 : vector<8x128xf32>
    %c0_6 = arith.constant 0 : index
    %c0_7 = arith.constant 0 : index
    %9 = vector.load %arg7[%c0_6, %c0_7] : memref<8x128xf32, #tpu.memory_space<vmem>>, vector<8x128xf32>
    tpu.vector_store %arg7[%c0_6, %c0_7], %8 {strides = array<i32>} : memref<8x128xf32, #tpu.memory_space<vmem>>, vector<8x128xf32>,
    return
  }
  func.func @transform_0(%arg0: i32, %arg1: i32) -> (i32, i32) {
    %c0_i32 = arith.constant 0 : i32
    %c0_i32_0 = arith.constant 0 : i32
    return %arg0, %c0_i32 : i32, i32
  }
  func.func @transform_1(%arg0: i32, %arg1: i32) -> (i32, i32) {
    %c0_i32 = arith.constant 0 : i32
    %c0_i32_0 = arith.constant 0 : i32
    %c0_i32_1 = arith.constant 0 : i32
    return %c0_i32, %c0_i32_0 : i32, i32
  }
  func.func @transform_2(%arg0: i32, %arg1: i32) -> (i32, i32) {
    %c0_i32 = arith.constant 0 : i32
    %c0_i32_0 = arith.constant 0 : i32
    %c0_i32_1 = arith.constant 0 : i32
    return %c0_i32, %c0_i32_0 : i32, i32
  }
  func.func @transform_3(%arg0: i32, %arg1: i32) -> (i32, i32) {
    %c0_i32 = arith.constant 0 : i32
    %c0_i32_0 = arith.constant 0 : i32
    return %c0_i32, %arg1 : i32, i32
  }
  func.func @transform_4(%arg0: i32, %arg1: i32) -> (i32, i32) {
    %c0_i32 = arith.constant 0 : i32
    %c0_i32_0 = arith.constant 0 : i32
    return %c0_i32, %arg1 : i32, i32
  }
  func.func @transform_5(%arg0: i32, %arg1: i32) -> (i32, i32) {
    %c0_i32 = arith.constant 0 : i32
    return %arg0, %arg1 : i32, i32
  }
}

</mosaic_0001>

<bundles_post_ra>
// kernel: tpu_custom_call.1
= control target key start
LH: loop header
LB: loop body
LE: loop exit
PB: predicated region body
PF: predicated region fallthrough
CT: control target
= control target key end

     0   :  { %s1266_s0 = inlined_call_operand.hbm [shape: f32[24,128], index: 0, kind: input, shape index: {}]   ;;  %s1267_s1 = inlined_call_operand.hbm [shape: f32[128,128], index: 1, kind: input, shape index: {}]   ;;  %s1268_s2 = inlined_call_operand.vmem [shape: f32[1,128], index: 2, kind: input, shape index: {}]   ;;  %s1269_s3 = inlined_call_operand.hbm [shape: f32[128,128], index: 3, kind: input, shape index: {}]   ;;  %s1270_s4 = inlined_call_operand.vmem [shape: f32[1,128], index: 4, kind: input, shape index: {}]   ;;  %s1271_s5 = inlined_call_operand.hbm [shape: f32[24,128], index: 5, kind: output, shape index: {}]  }
   0x1   :  { %1275 = sst [smem:[#allocation13_spill]] %s1267_s1 }
   0x2   :  { %10 = vsyncpa [#allocation4], 0 }
   0x3   :  { %12 = vsyncpa [#allocation4 + $0x1], 0 }
   0x4   :  { %13 = vsyncpa [#allocation7], 0 }
   0x5   :  { %14 = vsyncpa [#allocation5], 0 }
   0x6   :  { %16 = vsyncpa [#allocation5 + $0x1], 0  ;;  %s1041_s18 = smov 0   ;;  %s1043_s19 = smov 0  }
   0x7   :  { %s1045_s20 = smov 0   ;;  %s1047_s21 = smov 0  }
   0x8   :  { %s1049_s22 = smov 0   ;;  %s1051_s23 = smov 0  }
   0x9 LB: > { %s626_s24 = sadd.s32 4294967295, %s1001_s23   ;;  %s627_s25 = sadd.s32 4294967294, %s1001_s23   ;;  %s1001_s23 = sphi %s1051_s23, %s22_s23   ;;  %s997_s22 = sphi %s1049_s22, %s1292_s22   ;;  %s993_s21 = sphi %s1047_s21, %s1291_s21   ;;  %s989_s20 = sphi %s1045_s20, %s1290_s20   ;;  %s985_s19 = sphi %s1043_s19, %s1289_s19   ;;  %s981_s18 = sphi %s1041_s18, %s1288_s18  }
   0xa   : > { %p54_p0 = scmp.ne.s32.totalorder %s985_s19, %s981_s18  ;;  %p1075_p1 = scmp.eq.s32.totalorder %s626_s24, 0 }
   0xb   : > { %p1079_p2 = scmp.eq.s32.totalorder %s626_s24, 2  ;;  %p180_p3 = scmp.eq.s32.totalorder %s627_s25, 2 }
   0xc   : > { %s1276_s26 = scalar_select %p1075_p1, 1, 0 }
   0xd   : > { %p1085_p4 = por %p1075_p1, %p54_p0  ;;  %p628_p5 = scmp.ge.s32.totalorder %s1001_s23, 1 }
   0xe   : > { %p1090_p6 = por %p180_p3, %p54_p0  ;;  %p187_p7 = scmp.lt.s32.totalorder %s1001_s23, 4 }
   0xf   : > { %s1278_s28 = scalar_select %p1085_p4, 1, 0 }
  0x10   : > { %s1279_s29 = scalar_select %p1090_p6, 1, 0 }
  0x11   : > { %p1095_p8 = pnand %p628_p5, %p187_p7  ;;  %s1003_s6 = smov [#allocation6]  }
  0x12   : > { %s199_s7 = sshll.u32 %s1003_s6, 4  ;;  %s1004_s9 = smov [#allocation8]   ;;  %s200_s7 = int_to_ptr.vmem [resolvable:$true] %s199_s7 }
  0x13   : > { %p762_p9 = pneg %p1095_p8  ;;  %s217_s10 = sshll.u32 %s1004_s9, 4  ;;  %s218_s10 = int_to_ptr.vmem [resolvable:$true] %s217_s10 }
  0x14   : > { %s848_s11 = scalar_lea.vmem %s200_s7, 2048  ;;  %p856_p3 = scmp.lt.s32.totalorder %s200_s7, %s200_s7 }
  0x15   : > { %p1103_p10 = pnand %p762_p9, %p1075_p1  ;;  %p849_p12 = scmp.ne.s32.totalorder %s200_s7, %s848_s11 }
  0x16   : > { %p857_p5 = scmp.lt.s32.totalorder %s848_s11, %s848_s11 }
  0x17   : > { %p839_p11 = pneg %p1103_p10 }
  0x18   : > { %p858_p7 = por %p857_p5, %p856_p3 }
  0x19   : > { %p851_p13 = pnand %p849_p12, %p839_p11 }
  0x1b   : > { %p852_p0 = pneg %p851_p13 }
  0x1d   : > { %p859_p9 = pnand %p858_p7, %p852_p0 }
  0x1f   : > { %862 = shalt.err (!%p859_p9)
}
  0x20   : > { %s1005_s12 = smov 128   ;;  %s1006_s13 = smov 8  }
  0x21   : > { %s1282_s1 = sld [smem:[#allocation13_spill]]  ;;  %s874_s16 = scalar_lea.vmem %s218_s10, 2048 }
  0x22   : > { %p875_p6 = scmp.ne.s32.totalorder %s218_s10, %s874_s16  ;;  %p882_p1 = scmp.lt.s32.totalorder %s218_s10, %s218_s10 }
  0x23   : > { %p883_p4 = scmp.lt.s32.totalorder %s874_s16, %s874_s16 }
  0x24   : > { %p877_p12 = pnand %p875_p6, %p839_p11 }
  0x25   : > { %p884_p3 = por %p883_p4, %p882_p1 }
  0x26   : > { %p878_p13 = pneg %p877_p12 }
  0x27   : > { %765 = dma.hbm_to_vmem [thread:$0]  (!%p1103_p10), %s1282_s1, 2048, %s200_s7, [#allocation7], %s1005_s12, %s1005_s12, %s1006_s13  }
  0x28   : > { %p885_p0 = pnand %p884_p3, %p878_p13 }
  0x2a   : > { %888 = shalt.err (!%p885_p0)
}
  0x2b   : > { %768 = dma.hbm_to_vmem [thread:$0]  (!%p1103_p10), %s1269_s3, 2048, %s218_s10, [#allocation7], %s1005_s12, %s1005_s12, %s1006_s13  }
  0x2c   : > { %s34_s25 = sadd.s32 1, %s997_s22  ;;  %s41_s6 = sadd.s32 1, %s989_s20 }
  0x2d   : > { %p36_p1 = scmp.ge.s32.totalorder %s34_s25, 3  ;;  %p48_p4 = scmp.ne.s32.totalorder %s989_s20, %s985_s19 }
  0x2e   : > { %p49_p6 = scmp.eq.s32.totalorder %s1001_s23, 0  ;;  %p779_p11 = scmp.lt.s32.totalorder %s1001_s23, 3 }
  0x2f   : > { %s1294_s25 = smov (%p36_p1, %s34_s25), 0  ;;  %p1135_p7 = por %p1079_p2, %p48_p4 }
  0x30   : > { %p50_p5 = por %p49_p6, %p48_p4  ;;  %s38_s8 = ssub.s32 %s997_s22, %s1294_s25 }
  0x31   : > { %s237_s9 = sand.u32 1, %s989_s20   ;;  %p39_p9 = scmp.eq.s32.totalorder %s38_s8, 0 }
  0x32   : > { %s633_s10 = sshll.u32 %s237_s9, 3  ;;  %s634_s11 = sshll.u32 %s997_s22, 7 }
  0x33   : > { %s1144_s12 = scalar_select %p39_p9, %s989_s20, %s41_s6  }
  0x34   : > { %s246_s15 = scalar_lea.hbm %s1266_s0, %s634_s11  ;;  %s241_s16 = scalar_lea.vmem [#allocation3], %s633_s10 }
  0x35   : > { %s248_s17 = sshll.u32 %s241_s16, 4  ;;  %p1151_p10 = pnand %p779_p11, %p50_p5  ;;  %s249_s17 = int_to_ptr.vmem [resolvable:$true] %s248_s17 }
  0x36   : > { %s238_s24 = scalar_lea.sflag [#allocation4], %s237_s9  ;;  %s902_s8 = scalar_lea.vmem %s249_s17, 128 }
  0x37   : > { %p891_p2 = pneg %p1151_p10  ;;  %p903_p12 = scmp.ne.s32.totalorder %s249_s17, %s902_s8 }
  0x38   : > { %s1007_s6 = smov [#allocation3]  }
  0x39   : > { %p905_p13 = pnand %p903_p12, %p891_p2  ;;  %s907_s1 = sshll.u32 %s1007_s6, 4  ;;  %s908_s1 = int_to_ptr.vmem [resolvable:$false] %s907_s1 }
  0x3a   : > { %s909_s11 = scalar_lea.vmem %s908_s1, 256  ;;  %p910_p0 = scmp.lt.s32.totalorder %s249_s17, %s908_s1 }
  0x3b   : > { %p906_p3 = pneg %p905_p13  ;;  %p911_p1 = scmp.lt.s32.totalorder %s909_s11, %s902_s8 }
  0x3d   : > { %p912_p4 = por %p911_p1, %p910_p0 }
  0x3f   : > { %p913_p6 = pnand %p912_p4, %p906_p3 }
  0x41   : > { %916 = shalt.err (!%p913_p6)
}
  0x42   : > { %772 = dma.hbm_to_vmem [thread:$0]  (!%p1151_p10), %s246_s15, 128, %s249_s17, %s238_s24  }
  0x43   : > { %257 = sbr.rel (%p1095_p8) target bundleno = 515 (0x203), region = 40  ;;  %s1162_s9 = sand.u32 (!%p1095_p8), 1, %s985_s19  }
  0x44   : > { %s636_s10 = sshll.u32 (!%p1095_p8), %s1162_s9, 3  ;;  %s260_s13 = scalar_lea.sflag (!%p1095_p8), [#allocation4], %s1162_s9 }
  0x45   : > { %s1168_s1 = scalar_lea.vmem (!%p1095_p8), [#allocation3], %s636_s10  ;;  %p1285_p11 = scmp.ne.s32.totalorder (!%p1095_p8), %s1278_s28, 0 }
  0x48   : > { %968 = dma.done.wait (%p1285_p11), %s260_s13, 128  }
  0x49   : > { %970 = vsyncadd (%p1285_p11), %s260_s13, 4294967168  ;;  %p1286_p5 = scmp.ne.s32.totalorder %s1276_s26, 0 }
  0x4b   : > { %972 = dma.done.wait (%p1286_p5), [#allocation7], 4096  }
  0x4c   : > { %974 = vsyncadd (%p1286_p5), [#allocation7], 4294963200  ;;  %v1008_v0 = vmov 0.0   ;;  %vm1009_vm0 = vmmov 0   ;;  %v324_v1 = vld [vmem:[#allocation6 + $0x78] sm:$0xff]  ;;  %v323_v2 = vld [vmem:[#allocation6 + $0x70] sm:$0xff] }
  0x4d   : > { %680 = vmatprep.subr.mxu0 %v1008_v0  ;;  %712 = vmatprep.mubr.msk.f32.mxu0 %vm1009_vm0, %v1008_v0  ;;  %v322_v3 = vld [vmem:[#allocation6 + $0x68] sm:$0xff]  ;;  %v321_v4 = vld [vmem:[#allocation6 + $0x60] sm:$0xff]  ;;  %v420_v5 = vld [vmem:[#allocation8 + $0x78] sm:$0xff]  ;;  %s643_s15 = sshll.u32 %s993_s21, 7  ;;  %s300_s16 = scalar_lea.vmem [#allocation9], %s636_s10 }
  0x4e   : > { %715 = vmatprep.subr.mxu1 %v1008_v0  ;;  %747 = vmatprep.mubr.msk.f32.mxu1 %vm1009_vm0, %v1008_v0  ;;  %v320_v6 = vld [vmem:[#allocation6 + $0x58] sm:$0xff]  ;;  %v419_v7 = vld [vmem:[#allocation8 + $0x70] sm:$0xff]  ;;  %v418_v8 = vld [vmem:[#allocation8 + $0x68] sm:$0xff]  ;;  %s514_s17 = sshll.u32 %s300_s16, 4  ;;  %s1225_s8 = scalar_lea.hbm %s1271_s5, %s643_s15  ;;  %s515_s17 = int_to_ptr.vmem [resolvable:$true] %s514_s17 }
  0x4f   : > { %681 = vmatpush3.msra.mxu0 %v324_v1  ;;  %716 = vmatpush3.msra.mxu1 %v420_v5  ;;  %v319_v9 = vld [vmem:[#allocation6 + $0x50] sm:$0xff]  ;;  %v417_v10 = vld [vmem:[#allocation8 + $0x60] sm:$0xff]  ;;  %v318_v11 = vld [vmem:[#allocation6 + $0x48] sm:$0xff]  ;;  %s500_s6 = scalar_lea.sflag [#allocation5], %s1162_s9  ;;  %s917_s11 = scalar_lea.vmem %s515_s17, 128 }
  0x50   : > { %682 = vmatprep.subr.mxu0 %v1008_v0  ;;  %717 = vmatprep.subr.mxu1 %v1008_v0  ;;  %v416_v12 = vld [vmem:[#allocation8 + $0x58] sm:$0xff]  ;;  %v317_v13 = vld [vmem:[#allocation6 + $0x40] sm:$0xff]  ;;  %v415_v14 = vld [vmem:[#allocation8 + $0x50] sm:$0xff]  ;;  %p918_p8 = scmp.ne.s32.totalorder %s515_s17, %s917_s11  ;;  %s1010_s21 = smov [#allocation9]  }
  0x51   : > { %683 = vmatpush3.msra.mxu0 %v323_v2  ;;  %718 = vmatpush3.msra.mxu1 %v419_v7  ;;  %v316_v15 = vld [vmem:[#allocation6 + $0x38] sm:$0xff]  ;;  %v414_v16 = vld [vmem:[#allocation8 + $0x48] sm:$0xff]  ;;  %v315_v17 = vld [vmem:[#allocation6 + $0x30] sm:$0xff]  ;;  %s921_s13 = sshll.u32 %s1010_s21, 4  ;;  %s922_s13 = int_to_ptr.vmem [resolvable:$false] %s921_s13 }
  0x52   : > { %684 = vmatprep.subr.mxu0 %v1008_v0  ;;  %719 = vmatprep.subr.mxu1 %v1008_v0  ;;  %v413_v18 = vld [vmem:[#allocation8 + $0x40] sm:$0xff]  ;;  %v314_v19 = vld [vmem:[#allocation6 + $0x28] sm:$0xff]  ;;  %v412_v20 = vld [vmem:[#allocation8 + $0x38] sm:$0xff]  ;;  %p919_p9 = pnand %p918_p8, %p1135_p7  ;;  %s923_s10 = scalar_lea.vmem %s922_s13, 256 }
  0x53   : > { %685 = vmatpush3.msra.mxu0 %v322_v3  ;;  %720 = vmatpush3.msra.mxu1 %v418_v8  ;;  %v313_v21 = vld [vmem:[#allocation6 + $0x20] sm:$0xff]  ;;  %v411_v22 = vld [vmem:[#allocation8 + $0x30] sm:$0xff]  ;;  %v312_v23 = vld [vmem:[#allocation6 + $0x18] sm:$0xff]  ;;  %p924_p2 = scmp.lt.s32.totalorder %s515_s17, %s922_s13  ;;  %p925_p12 = scmp.lt.s32.totalorder %s923_s10, %s917_s11 }
  0x54   : > { %686 = vmatprep.subr.mxu0 %v1008_v0  ;;  %721 = vmatprep.subr.mxu1 %v1008_v0  ;;  %v410_v24 = vld [vmem:[#allocation8 + $0x28] sm:$0xff]  ;;  %v311_v25 = vld [vmem:[#allocation6 + $0x10] sm:$0xff]  ;;  %v409_v26 = vld [vmem:[#allocation8 + $0x20] sm:$0xff]  ;;  %p920_p10 = pneg %p919_p9 }
  0x55   : > { %687 = vmatpush3.msra.mxu0 %v321_v4  ;;  %722 = vmatpush3.msra.mxu1 %v417_v10  ;;  %v310_v27 = vld [vmem:[#allocation6 + $0x8] sm:$0xff]  ;;  %v408_v28 = vld [vmem:[#allocation8 + $0x18] sm:$0xff]  ;;  %v309_v29 = vld [vmem:[#allocation6] sm:$0xff]  ;;  %p926_p13 = por %p925_p12, %p924_p2 }
  0x56   : > { %688 = vmatprep.subr.mxu0 %v1008_v0  ;;  %723 = vmatprep.subr.mxu1 %v1008_v0  ;;  %v308_v30 = vld [vmem:[%s1168_s1] sm:$0xff]  ;;  %v406_v32 = vld [vmem:[#allocation8 + $0x8] sm:$0xff]  ;;  %v405_v33 = vld [vmem:[#allocation8] sm:$0xff] }
  0x57   : > { %689 = vmatpush3.msra.mxu0 %v320_v6  ;;  %724 = vmatpush3.msra.mxu1 %v416_v12  ;;  %v407_v31 = vld [vmem:[#allocation8 + $0x10] sm:$0xff]  ;;  %p927_p3 = pnand %p926_p13, %p920_p10 }
  0x58   : > { %690 = vmatprep.subr.mxu0 %v1008_v0  ;;  %725 = vmatprep.subr.mxu1 %v1008_v0  ;;  %v640_v34 = vld [vmem:[%s1268_s2] ss:$0 sm:$0xff] }
  0x59   : > { %691 = vmatpush3.msra.mxu0 %v319_v9  ;;  %726 = vmatpush3.msra.mxu1 %v415_v14  ;;  %v641_v39 = vld [vmem:[%s1270_s4] ss:$0 sm:$0xff] }
  0x5a   : > { %692 = vmatprep.subr.mxu0 %v1008_v0  ;;  %727 = vmatprep.subr.mxu1 %v1008_v0 }
  0x5b   : > { %693 = vmatpush3.msra.mxu0 %v318_v11  ;;  %728 = vmatpush3.msra.mxu1 %v414_v16 }
  0x5c   : > { %694 = vmatprep.subr.mxu0 %v1008_v0  ;;  %729 = vmatprep.subr.mxu1 %v1008_v0 }
  0x5d   : > { %695 = vmatpush3.msra.mxu0 %v317_v13  ;;  %730 = vmatpush3.msra.mxu1 %v413_v18 }
  0x5e   : > { %696 = vmatprep.subr.mxu0 %v1008_v0  ;;  %731 = vmatprep.subr.mxu1 %v1008_v0 }
  0x5f   : > { %697 = vmatpush3.msra.mxu0 %v316_v15  ;;  %732 = vmatpush3.msra.mxu1 %v412_v20 }
  0x60   : > { %698 = vmatprep.subr.mxu0 %v1008_v0  ;;  %733 = vmatprep.subr.mxu1 %v1008_v0 }
  0x61   : > { %699 = vmatpush3.msra.mxu0 %v315_v17  ;;  %734 = vmatpush3.msra.mxu1 %v411_v22 }
  0x62   : > { %700 = vmatprep.subr.mxu0 %v1008_v0  ;;  %735 = vmatprep.subr.mxu1 %v1008_v0 }
  0x63   : > { %701 = vmatpush3.msra.mxu0 %v314_v19  ;;  %736 = vmatpush3.msra.mxu1 %v410_v24 }
  0x64   : > { %702 = vmatprep.subr.mxu0 %v1008_v0  ;;  %737 = vmatprep.subr.mxu1 %v1008_v0 }
  0x65   : > { %703 = vmatpush3.msra.mxu0 %v313_v21  ;;  %738 = vmatpush3.msra.mxu1 %v409_v26 }
  0x66   : > { %704 = vmatprep.subr.mxu0 %v1008_v0  ;;  %739 = vmatprep.subr.mxu1 %v1008_v0 }
  0x67   : > { %705 = vmatpush3.msra.mxu0 %v312_v23  ;;  %740 = vmatpush3.msra.mxu1 %v408_v28 }
  0x68   : > { %706 = vmatprep.subr.mxu0 %v1008_v0  ;;  %741 = vmatprep.subr.mxu1 %v1008_v0 }
  0x69   : > { %707 = vmatpush3.msra.mxu0 %v311_v25  ;;  %742 = vmatpush3.msra.mxu1 %v407_v31 }
  0x6a   : > { %708 = vmatprep.subr.mxu0 %v1008_v0  ;;  %743 = vmatprep.subr.mxu1 %v1008_v0 }
  0x6b   : > { %709 = vmatpush3.msra.mxu0 %v310_v27  ;;  %744 = vmatpush3.msra.mxu1 %v406_v32 }
  0x6c   : > { %710 = vmatprep.subr.mxu0 %v1008_v0  ;;  %745 = vmatprep.subr.mxu1 %v1008_v0 }
  0x6d   : > { %711 = vmatpush3.msra.mxu0 %v309_v29  ;;  %746 = vmatpush3.msra.mxu1 %v405_v33 }
  0x6e   : > { %713 = vmatmul.mubr.f32.vlgmr.msra.gmra.mxu0 %v308_v30 }
 0x12e   : > { %v398_v35 = vpop.f32.mrf.mxu0 }
 0x12f   : > { %v399_v36 = vadd.f32 %v640_v34, %v398_v35 }
 0x130   : > { %v714_v37 = vpop.f32.mrf.mxu0 }
 0x131   : > { %v402_v38 = vmax.f32 %v399_v36, 0.0 }
 0x133   : > { %748 = vmatmul.mubr.f32.vlgmr.msra.gmra.mxu1 %v402_v38 }
 0x1f3   : > { %v494_v40 = vpop.f32.mrf.mxu1 }
 0x1f4   : > { %v495_v41 = vadd.f32 %v641_v39, %v494_v40 }
 0x1f5   : > { %v749_v42 = vpop.f32.mrf.mxu1 }
 0x1f6   : > { %498 = vst [vmem:[%s300_s16] sm:$0xff] %v495_v41 }
 0x1f7   : > { %930 = shalt.err (!%p927_p3)
}
 0x1f8   : > { %s931_s1 = scalar_lea.hbm %s1225_s8, 128  ;;  %s935_s28 = scalar_lea.hbm %s1271_s5, 384 }
 0x1f9   : > { %p932_p0 = scmp.ne.s32.totalorder %s1225_s8, %s931_s1  ;;  %p936_p6 = scmp.lt.s32.totalorder %s1225_s8, %s1271_s5 }
 0x1fa   : > { %p937_p11 = scmp.lt.s32.totalorder %s935_s28, %s931_s1 }
 0x1fb   : > { %p933_p1 = pnand %p932_p0, %p1135_p7 }
 0x1fc   : > { %p938_p5 = por %p937_p11, %p936_p6 }
 0x1fd   : > { %p934_p4 = pneg %p933_p1 }
 0x1ff   : > { %p939_p8 = pnand %p938_p5, %p934_p4 }
 0x201   : > { %942 = shalt.err (!%p939_p8)
}
 0x202   : > { %760 = dma.vmem_to_hbm [thread:$0]  (%p1135_p7), %s515_s17, 128, %s1225_s8, %s500_s6  }
 0x203 PF: > { %p782_p9 = scmp.ge.s32.totalorder %s1001_s23, 2  ;;  %s526_s15 = sand.u32 1, %s981_s18  }
 0x204   : > { %p1287_p10 = scmp.ne.s32.totalorder %s1279_s29, 0  ;;  %s527_s16 = scalar_lea.sflag [#allocation5], %s526_s15 }
 0x206   : > { %p774_p2 = pnand %p782_p9, %p1287_p10 }
 0x208   : > { %p775_p12 = pneg %p774_p2 }
 0x20a   : > { %976 = dma.done.wait (%p775_p12), %s527_s16, 128  }
 0x20b   : > { %978 = vsyncadd (%p775_p12), %s527_s16, 4294967168  ;;  %s22_s23 = sadd.s32 1, %s1001_s23   ;;  %s1288_s18 = smov %s985_s19 }
 0x20c   : > { %p19_p13 = scmp.ge.s32.totalorder %s22_s23, 5   ;;  %s1289_s19 = smov %s989_s20 }
 0x20d   : > { %s1290_s20 = smov %s1144_s12  ;;  %s1291_s21 = smov %s997_s22 }
 0x20e   : > { %s1292_s22 = smov %s1294_s25  ;;  %21 = sbr.rel (!%p19_p13) target bundleno = 9 (0x9), region = 101 }
 0x213   :  { %532 = vsyncpa [#allocation4], 1 }
 0x214   :  { %534 = vsyncpa [#allocation4 + $0x1], 1 }
 0x215   :  { %535 = vsyncpa [#allocation7], 1 }
 0x216   :  { %536 = vsyncpa [#allocation5], 1 }
 0x217   :  { %538 = vsyncpa [#allocation5 + $0x1], 1 }

</bundles_post_ra>
